<compile_context>
chip_gen: v7x
topology: tpu7x:2x2x1
jax: 0.10.0
libtpu: 0.0.40
codegen_flags: <defaults>
</compile_context>

<pallas_src>
import jax
import jax.numpy as jnp
import numpy as np
from jax.experimental import pallas as pl
from jax.experimental.pallas import tpu as pltpu


def fused_dsc_kernel(w_ref, b_ref, x_ref, o_ref):
    # w_ref: (Cout, K)   fused depthwise*pointwise weights, K = C*KH*KW
    # b_ref: (Cout, 1)   fused bias
    # x_ref: (K, TL)     im2col'd input columns (lane-dense)
    # o_ref: (Cout, TL)  lane-dense output slab
    acc = jnp.dot(w_ref[...], x_ref[...], preferred_element_type=jnp.float32)
    # activation=None in this configuration -> identity.
    # TODO(synk): a non-None activation in DepthSepConv2D is applied *between*
    # the depthwise and pointwise convs, which would invalidate this fusion;
    # that config would need the unfused two-stage formulation.
    o_ref[...] = (acc + b_ref[...]).astype(o_ref.dtype)


def _pick_lane_tile(L):
    """Largest multiple-of-128 tile dividing L (capped at 2048); else full L."""
    if L <= 2048 or L % 128 != 0:
        return L
    for cand in (2048, 1024, 512, 256, 128):
        if L % cand == 0:
            return cand
    return L


def depth_sep_conv2d(x, dw_w, dw_b, pw_w, pw_b, kernel_size=(3, 3)):
    """x: (N, C, H, W) float32.  Returns (N, Cout, H, W) == DepthSepConv2D.forward."""
    N, C, H, W = x.shape
    KH, KW = kernel_size
    Cout = pw_w.shape[0]
    K = C * KH * KW
    L = N * H * W
    ph, pw_ = (KH - 1) // 2, (KW - 1) // 2  # symmetric padding (odd kernel)

    # ---- wrapper-side algebraic fusion of the two convs (params only) ----
    w_eff = (pw_w[:, :, None, None] * dw_w[None, :, :, :]).reshape(Cout, K)
    b_eff = (pw_b + pw_w @ dw_b).reshape(Cout, 1)

    # ---- wrapper-side pad + im2col to a lane-dense (K, N*H*W) slab ----
    xp = jnp.pad(x, ((0, 0), (0, 0), (ph, ph), (pw_, pw_)))
    patches = jnp.stack(
        [xp[:, :, kh:kh + H, kw:kw + W] for kh in range(KH) for kw in range(KW)],
        axis=2)                                            # (N, C, KH*KW, H, W)
    cols = patches.reshape(N, K, H * W)
    cols = jnp.transpose(cols, (1, 0, 2)).reshape(K, L)    # (K, N*H*W)

    TL = _pick_lane_tile(L)
    grid = (L // TL,)

    out_flat = pl.pallas_call(
        fused_dsc_kernel,
        out_shape=jax.ShapeDtypeStruct((Cout, L), x.dtype),
        grid_spec=pltpu.PrefetchScalarGridSpec(
            num_scalar_prefetch=0,
            grid=grid,
            in_specs=[
                pl.BlockSpec((Cout, K), lambda l: (0, 0)),   # fused weights
                pl.BlockSpec((Cout, 1), lambda l: (0, 0)),   # fused bias
                pl.BlockSpec((K, TL), lambda l: (0, l)),     # im2col columns
            ],
            out_specs=pl.BlockSpec((Cout, TL), lambda l: (0, l)),
        ),
        compiler_params=pltpu.CompilerParams(
            dimension_semantics=("parallel",)),
    )(w_eff, b_eff, cols)

    # back to NCHW (layout plumbing in the wrapper, outside the kernel)
    return jnp.transpose(out_flat.reshape(Cout, N, H, W), (1, 0, 2, 3))


def reference(x, dw_w, dw_b, pw_w, pw_b):
    """Pure-JAX reference matching PyTorch Conv2d semantics (NCHW)."""
    C = x.shape[1]
    Cout = pw_w.shape[0]
    KH, KW = dw_w.shape[1], dw_w.shape[2]
    # depthwise: groups = C, weight (C, 1, KH, KW)
    y = jax.lax.conv_general_dilated(
        x, dw_w.reshape(C, 1, KH, KW),
        window_strides=(1, 1), padding=(((KH - 1) // 2,) * 2, ((KW - 1) // 2,) * 2),
        dimension_numbers=("NCHW", "OIHW", "NCHW"),
        feature_group_count=C)
    y = y + dw_b.reshape(1, C, 1, 1)
    # pointwise 1x1
    z = jax.lax.conv_general_dilated(
        y, pw_w.reshape(Cout, C, 1, 1),
        window_strides=(1, 1), padding="VALID",
        dimension_numbers=("NCHW", "OIHW", "NCHW"))
    return z + pw_b.reshape(1, Cout, 1, 1)


if __name__ == "__main__":
    N, Cin, H, W = 2, 4, 16, 16
    Cout = 8
    KH, KW = 3, 3

    key = jax.random.PRNGKey(0)
    kx, k1, k2, k3, k4 = jax.random.split(key, 5)

    x = jax.random.normal(kx, (N, Cin, H, W), jnp.float32)

    # Deterministic kaiming-uniform-style init (matches nn.Conv2d param shapes).
    fan_dw = (Cin // Cin) * KH * KW  # = 9  (in_channels/groups * KH * KW)
    bound_dw = float(np.sqrt(1.0 / fan_dw))
    dw_w = jax.random.uniform(k1, (Cin, KH, KW), jnp.float32, -bound_dw, bound_dw)
    dw_b = jax.random.uniform(k2, (Cin,), jnp.float32, -bound_dw, bound_dw)

    fan_pw = Cin * 1 * 1
    bound_pw = float(np.sqrt(1.0 / fan_pw))
    pw_w = jax.random.uniform(k3, (Cout, Cin), jnp.float32, -bound_pw, bound_pw)
    pw_b = jax.random.uniform(k4, (Cout,), jnp.float32, -bound_pw, bound_pw)

    out = depth_sep_conv2d(x, dw_w, dw_b, pw_w, pw_b, kernel_size=(KH, KW))
    out = jax.block_until_ready(out)

    ref = jax.block_until_ready(reference(x, dw_w, dw_b, pw_w, pw_b))
    assert out.shape == (N, Cout, H, W)
    np.testing.assert_allclose(np.asarray(out), np.asarray(ref), rtol=1e-5, atol=1e-5)

    print("KERNEL_OK")
</pallas_src>

<mosaic_0001>
module attributes {stable_mosaic.version = 11 : i64} {
  func.func @fused_dsc_kernel(%arg0: i32, %arg1: memref<8x36xf32, #tpu.memory_space<vmem>>, %arg2: memref<8x1xf32, #tpu.memory_space<vmem>>, %arg3: memref<36x512xf32, #tpu.memory_space<vmem>>, %arg4: memref<8x512xf32, #tpu.memory_space<vmem>>) attributes {dimension_semantics = [#tpu.dimension_semantics<parallel>], iteration_bounds = array<i64: 1>, scalar_prefetch = 0 : i64, scratch_operands = 0 : i64, tpu.core_type = #tpu.core_type<tc>, window_params = [{pipeline_mode = #tpu.pipeline_mode<synchronous>, transform_indices = @transform_0, window_bounds = array<i64: 8, 36>}, {pipeline_mode = #tpu.pipeline_mode<synchronous>, transform_indices = @transform_1, window_bounds = array<i64: 8, 1>}, {transform_indices = @transform_2, window_bounds = array<i64: 36, 512>}, {transform_indices = @transform_3, window_bounds = array<i64: 8, 512>}]} {
    %c0 = arith.constant 0 : index
    %c0_0 = arith.constant 0 : index
    %0 = vector.load %arg1[%c0, %c0_0] : memref<8x36xf32, #tpu.memory_space<vmem>>, vector<8x36xf32>
    %c0_1 = arith.constant 0 : index
    %c0_2 = arith.constant 0 : index
    %1 = vector.load %arg3[%c0_1, %c0_2] : memref<36x512xf32, #tpu.memory_space<vmem>>, vector<36x512xf32>
    %cst = arith.constant dense<0.000000e+00> : vector<8x512xf32>
    %2 = tpu.matmul %0, %1, %cst {dimension_numbers = #tpu.dot_dimension_numbers<[1], [0], [0], [1], [0, 0, 1, 1], [], []>} : vector<8x36xf32>, vector<36x512xf32>, vector<8x512xf32> -> vector<8x512xf32>
    %c0_3 = arith.constant 0 : index
    %c0_4 = arith.constant 0 : index
    %3 = vector.load %arg2[%c0_3, %c0_4] : memref<8x1xf32, #tpu.memory_space<vmem>>, vector<8x1xf32>
    %4 = vector.broadcast %3 : vector<8x1xf32> to vector<8x512xf32>
    %5 = arith.addf %2, %4 : vector<8x512xf32>
    %c0_5 = arith.constant 0 : index
    %c0_6 = arith.constant 0 : index
    %6 = vector.load %arg4[%c0_5, %c0_6] : memref<8x512xf32, #tpu.memory_space<vmem>>, vector<8x512xf32>
    tpu.vector_store %arg4[%c0_5, %c0_6], %5 {strides = array<i32>} : memref<8x512xf32, #tpu.memory_space<vmem>>, vector<8x512xf32>,
    return
  }
  func.func @transform_0(%arg0: i32) -> (i32, i32) {
    %c0_i32 = arith.constant 0 : i32
    %c0_i32_0 = arith.constant 0 : i32
    %c0_i32_1 = arith.constant 0 : i32
    return %c0_i32, %c0_i32_0 : i32, i32
  }
  func.func @transform_1(%arg0: i32) -> (i32, i32) {
    %c0_i32 = arith.constant 0 : i32
    %c0_i32_0 = arith.constant 0 : i32
    %c0_i32_1 = arith.constant 0 : i32
    return %c0_i32, %c0_i32_0 : i32, i32
  }
  func.func @transform_2(%arg0: i32) -> (i32, i32) {
    %c0_i32 = arith.constant 0 : i32
    %c0_i32_0 = arith.constant 0 : i32
    return %c0_i32, %arg0 : i32, i32
  }
  func.func @transform_3(%arg0: i32) -> (i32, i32) {
    %c0_i32 = arith.constant 0 : i32
    %c0_i32_0 = arith.constant 0 : i32
    return %c0_i32, %arg0 : i32, i32
  }
}

</mosaic_0001>

<bundles_post_ra>
// kernel: tpu_custom_call.1
= control target key start
LH: loop header
LB: loop body
LE: loop exit
PB: predicated region body
PF: predicated region fallthrough
CT: control target
= control target key end

     0   :  { %8 = vsyncpa [#allocation3], 0  ;;  %s367_s0 = inlined_call_operand.vmem [shape: f32[8,36], index: 0, kind: input, shape index: {}]   ;;  %s368_s1 = inlined_call_operand.vmem [shape: f32[8,1], index: 1, kind: input, shape index: {}]   ;;  %s369_s2 = inlined_call_operand.hbm [shape: f32[36,512], index: 2, kind: input, shape index: {}]   ;;  %s370_s3 = inlined_call_operand.hbm [shape: f32[8,512], index: 3, kind: output, shape index: {}]  }
   0x1   :  { %9 = vsyncpa [#allocation4], 0  ;;  %s311_s12 = smov [#allocation2]   ;;  %s263_s16 = scalar_lea.hbm %s369_s2, 2560 }
   0x2   :  { %s19_s13 = sshll.u32 %s311_s12, 4  ;;  %p264_p0 = scmp.ne.s32.totalorder %s369_s2, %s263_s16  ;;  %s20_s13 = int_to_ptr.vmem [resolvable:$true] %s19_s13 }
   0x3   :  { %p267_p1 = scmp.lt.u32.totalorder %s263_s16, %s369_s2 }
   0x5   :  { %p269_p2 = pnand %p267_p1, %p264_p0 }
   0x7   :  { %272 = shalt.err (!%p269_p2)
}
   0x8   :  { %s273_s21 = scalar_lea.vmem %s20_s13, 2560  ;;  %p278_p4 = scmp.lt.s32.totalorder %s20_s13, %s20_s13 }
   0x9   :  { %p274_p3 = scmp.ne.s32.totalorder %s20_s13, %s273_s21  ;;  %p279_p5 = scmp.lt.s32.totalorder %s273_s21, %s273_s21 }
   0xb   :  { %p280_p6 = por %p279_p5, %p278_p4 }
   0xd   :  { %p281_p7 = pnand %p280_p6, %p274_p3 }
   0xf   :  { %284 = shalt.err (!%p281_p7)
}
  0x10   :  { %s312_s22 = smov 512   ;;  %s313_s23 = smov 32  }
  0x11   :  { %25 = dma.hbm_to_vmem [thread:$0]  %s369_s2, 2560, %s20_s13, [#allocation3], %s312_s22, %s312_s22, %s313_s23  }
  0x12   :  { %307 = dma.done.wait [#allocation3], 2560  }
  0x13   :  { %308 = vsyncadd [#allocation3], 4294964736  ;;  %v314_v0 = vmov 0.0   ;;  %v315_v1 = vmov 0   ;;  %v31_v2 = vld [vmem:[#allocation2 + $0x8] sm:$0xff]  ;;  %v33_v4 = vld [vmem:[#allocation2 + $0x18] sm:$0xff] }
  0x14   :  { %137 = vmatprep.mubr.f32.mxu0 %v314_v0  ;;  %208 = vmatprep.mubr.f32.mxu1 %v314_v0  ;;  %v35_v3 = vld [vmem:[#allocation2 + $0x28] sm:$0xff]  ;;  %v37_v6 = vld [vmem:[#allocation2 + $0x38] sm:$0xff]  ;;  %v30_v7 = vld [vmem:[#allocation2] sm:$0xff]  ;;  %vm60_vm0 = vcmask 1043456   ;;  %vm56_vm1 = vcmask 293888   ;;  %s316_s29 = smov [#allocation5]  }
  0x15   :  { %262 = vset.pattern.permute.xlu0 %v315_v1  ;;  %v240_v5 = vpack.c.bf16 %v35_v3, %v31_v2  ;;  %v34_v8 = vld [vmem:[#allocation2 + $0x20] sm:$0xff]  ;;  %v248_v9 = vpack.c.bf16 %v37_v6, %v33_v4  ;;  %v32_v11 = vld [vmem:[#allocation2 + $0x10] sm:$0xff]  ;;  %v39_v13 = vld [vmem:[#allocation2 + $0x48] sm:$0xff] }
  0x16   :  { %v242_v10 = vpack.c.bf16 %v34_v8, %v30_v7  ;;  %v36_v12 = vld [vmem:[#allocation2 + $0x30] sm:$0xff]  ;;  %v43_v15 = vld [vmem:[#allocation2 + $0x68] sm:$0xff]  ;;  %v41_v16 = vld [vmem:[#allocation2 + $0x58] sm:$0xff] }
  0x17   :  { %241 = vmatprep.subr.bf16.mxu0 %v240_v5  ;;  %v250_v14 = vpack.c.bf16 %v36_v12, %v32_v11  ;;  %v45_v17 = vld [vmem:[#allocation2 + $0x78] sm:$0xff]  ;;  %249 = vmatprep.subr.bf16.mxu1 %v248_v9  ;;  %v244_v18 = vpack.c.bf16 %v43_v15, %v39_v13  ;;  %v38_v20 = vld [vmem:[#allocation2 + $0x40] sm:$0xff]  ;;  %v40_v22 = vld [vmem:[#allocation2 + $0x50] sm:$0xff] }
  0x18   :  { %243 = vmatpush1.bf16.msra.mxu0 %v242_v10  ;;  %v252_v19 = vpack.c.bf16 %v45_v17, %v41_v16  ;;  %v42_v21 = vld [vmem:[#allocation2 + $0x60] sm:$0xff]  ;;  %v44_v24 = vld [vmem:[#allocation2 + $0x70] sm:$0xff]  ;;  %v47_v26 = vld [vmem:[#allocation2 + $0x88] sm:$0xf] }
  0x19   :  { %251 = vmatpush1.bf16.msra.mxu1 %v250_v14  ;;  %v246_v23 = vpack.c.bf16 %v42_v21, %v38_v20  ;;  %245 = vmatprep.subr.bf16.mxu0 %v244_v18  ;;  %v254_v25 = vpack.c.bf16 %v44_v24, %v40_v22  ;;  %v49_v27 = vld [vmem:[#allocation2 + $0x98] sm:$0xf]  ;;  %v50_v28 = vld [vmem:[%s368_s1] sm:$0xff]  ;;  %v48_v30 = vld [vmem:[#allocation2 + $0x90] sm:$0xf]  ;;  %s225_s1 = sshll.u32 %s316_s29, 4  ;;  %s226_s1 = int_to_ptr.vmem [resolvable:$true] %s225_s1 }
  0x1a   :  { %253 = vmatprep.subr.bf16.mxu1 %v252_v19  ;;  %53 = vperm.xlu0 %262, %v50_v28   ;;  %v46_v29 = vld [vmem:[#allocation2 + $0x80] sm:$0xf]  ;;  %p290_p9 = scmp.lt.s32.totalorder %s226_s1, %s226_s1 }
  0x1b   :  { %v29_v31 = vld [vmem:[%s367_s0] sm:$0xff]  ;;  %s285_s0 = scalar_lea.vmem %s226_s1, 512 }
  0x1c   :  { %247 = vmatpush1.bf16.msra.mxu0 %v246_v23  ;;  %p286_p8 = scmp.ne.s32.totalorder %s226_s1, %s285_s0  ;;  %p291_p10 = scmp.lt.s32.totalorder %s285_s0, %s285_s0 }
  0x1d   :  { %255 = vmatpush1.bf16.msra.mxu1 %v254_v25  ;;  %234 = vmatprep.subr.msk.mxu0 %vm60_vm0, %v47_v26 }
  0x1e   :  { %237 = vmatprep.subr.msk.mxu1 %vm60_vm0, %v49_v27  ;;  %p292_p11 = por %p291_p10, %p290_p9 }
  0x20   :  { %235 = vmatpush1.msk.msra.mxu0 %vm60_vm0, %v46_v29  ;;  %p293_p12 = pnand %p292_p11, %p286_p8 }
  0x21   :  { %238 = vmatpush1.msk.msra.mxu1 %vm60_vm0, %v48_v30  ;;  %236 = vmatmul.mubr.msk.f32.vlgmr.msra.gmra.mrb[0].mxu0 %vm56_vm1, %v29_v31 }
  0x22   :  { %239 = vmatmul.mubr.msk.f32.vlgmr.msra.gmra.mrb[0].mxu1 %vm56_vm1, %v29_v31 }
  0x99   :  { %v54_v32 = vpop.permute.xlu0 %53 }
  0xf4   :  { %v139_v33 = vpop.f32.mrb[0].mxu0 }
  0xf5   :  { %v140_v34 = vadd.f32 %v139_v33, %v54_v32  ;;  %v210_v35 = vpop.f32.mrb[0].mxu1  ;;  %v141_v36 = vpop.f32.mrb[1].mxu0 }
  0xf6   :  { %v211_v37 = vadd.f32 %v210_v35, %v54_v32  ;;  %v142_v38 = vadd.f32 %v141_v36, %v54_v32  ;;  %v212_v39 = vpop.f32.mrb[1].mxu1 }
  0xf7   :  { %215 = vst [vmem:[#allocation5] sm:$0xff] %v140_v34  ;;  %v213_v40 = vadd.f32 %v212_v39, %v54_v32 }
  0xf8   :  { %217 = vst [vmem:[#allocation5 + $0x10] sm:$0xff] %v211_v37  ;;  %216 = vst [vmem:[#allocation5 + $0x8] sm:$0xff] %v142_v38 }
  0xf9   :  { %218 = vst [vmem:[#allocation5 + $0x18] sm:$0xff] %v213_v40 }
  0xfa   :  { %296 = shalt.err (!%p293_p12)
}
  0xfb   :  { %s297_s5 = scalar_lea.hbm %s370_s3, 512 }
  0xfc   :  { %p298_p13 = scmp.ne.s32.totalorder %s370_s3, %s297_s5  ;;  %p301_p0 = scmp.lt.u32.totalorder %s297_s5, %s370_s3 }
  0xfe   :  { %p303_p1 = pnand %p301_p0, %p298_p13 }
 0x100   :  { %306 = shalt.err (!%p303_p1)
}
 0x101   :  { %228 = dma.vmem_to_hbm [thread:$0]  %s226_s1, 512, %s370_s3, [#allocation4]  }
 0x102   :  { %309 = dma.done.wait [#allocation4], 512  }
 0x103   :  { %310 = vsyncadd [#allocation4], 4294966784 }
 0x104   :  { %232 = vsyncpa [#allocation3], 1 }
 0x105   :  { %233 = vsyncpa [#allocation4], 1 }

</bundles_post_ra>
